<compile_context>
chip_gen: v7x
topology: tpu7x:2x2x1
jax: 0.10.0
libtpu: 0.0.40
codegen_flags: <defaults>
</compile_context>

<pallas_src>
import numpy as np
import jax
import jax.numpy as jnp
from jax.experimental import pallas as pl
from jax.experimental.pallas import tpu as pltpu


def _round_up(x, m):
    return ((x + m - 1) // m) * m


# ---------------------------------------------------------------------------
# Pallas kernel: fused 2-layer MLP head
# ---------------------------------------------------------------------------
def _make_head_kernel(n_inputs, compute_dtype):
    def kernel(*refs):
        x_refs = refs[:n_inputs]
        w1_refs = refs[n_inputs:2 * n_inputs]
        b1_ref, w2_ref, b2_ref, o_ref = refs[2 * n_inputs:]

        # first layer: accumulate partial matmuls (split-W1 for the edge branch)
        h = None
        for x_ref, w1_ref in zip(x_refs, w1_refs):
            part = jnp.dot(x_ref[...].astype(compute_dtype),   # bf16 MXU operands
                           w1_ref[...],                        # already compute_dtype
                           preferred_element_type=jnp.float32)
            h = part if h is None else h + part
        h = jnp.maximum(h + b1_ref[...], 0.0)                  # bias+ReLU in f32 (VPU)

        # second layer: Dout is lane-padded to a multiple of 128 -> dense stores
        y = jnp.dot(h.astype(compute_dtype), w2_ref[...],
                    preferred_element_type=jnp.float32) + b2_ref[...]
        o_ref[...] = jax.nn.sigmoid(y)                         # sigmoid in f32 (EUP)
    return kernel


def mlp_head(xs, w1ts, b1, w2t, b2, *, dout, tile_m=512,
             compute_dtype=jnp.bfloat16):
    """Fused sigmoid(relu(sum_i xs[i] @ w1ts[i] + b1) @ w2t + b2).

    xs:    list of (M, Din_i) f32 row-major activations (rows = edges/nodes)
    w1ts:  list of (Din_i, Hp) first-layer weight slices (Hp multiple of 128)
    b1:    (1, Hp);  w2t: (Hp, Dp);  b2: (1, Dp)   (Dp multiple of 128)
    dout:  number of valid output lanes (<= Dp); padded lanes are sliced off.
    """
    M = xs[0].shape[0]
    Hp = w1ts[0].shape[1]
    Dp = w2t.shape[1]

    # row tiling: multiple of 8, no larger than the (row-padded) problem
    tile_m = max(8, min(tile_m, _round_up(M, 8)))
    tile_m = _round_up(tile_m, 8)
    m_pad = _round_up(M, tile_m)
    if m_pad != M:
        # padded rows produce garbage (bias+sigmoid) but are sliced off below
        xs = [jnp.pad(x, ((0, m_pad - M), (0, 0))) for x in xs]

    # weights feed the MXU in compute_dtype (cast once here, not per grid step);
    # biases / activations / accumulation stay f32.
    w1ts = [w.astype(compute_dtype) for w in w1ts]
    w2t = w2t.astype(compute_dtype)

    n = len(xs)
    kernel = _make_head_kernel(n, compute_dtype)

    in_specs = [pl.BlockSpec((tile_m, x.shape[1]), lambda i: (i, 0)) for x in xs]
    in_specs += [pl.BlockSpec(w.shape, lambda i: (0, 0)) for w in w1ts]   # resident
    in_specs += [pl.BlockSpec((1, Hp), lambda i: (0, 0)),
                 pl.BlockSpec((Hp, Dp), lambda i: (0, 0)),
                 pl.BlockSpec((1, Dp), lambda i: (0, 0))]

    din_total = sum(x.shape[1] for x in xs)
    wbytes = compute_dtype(0).dtype.itemsize
    cost = pl.CostEstimate(
        flops=2 * m_pad * (din_total * Hp + Hp * Dp),
        transcendentals=m_pad * Dp,
        bytes_accessed=(4 * m_pad * din_total                 # x tiles (f32)
                        + wbytes * (din_total * Hp + Hp * Dp)  # weights
                        + 4 * (Hp + Dp)                        # biases
                        + 4 * m_pad * Dp))                     # output

    out = pl.pallas_call(
        kernel,
        out_shape=jax.ShapeDtypeStruct((m_pad, Dp), jnp.float32),
        grid_spec=pltpu.PrefetchScalarGridSpec(
            num_scalar_prefetch=0,
            grid=(m_pad // tile_m,),
            in_specs=in_specs,
            out_specs=pl.BlockSpec((tile_m, Dp), lambda i: (i, 0)),
        ),
        compiler_params=pltpu.CompilerParams(
            dimension_semantics=("parallel",)),   # megacore sharding on v7x
        cost_estimate=cost,
    )(*xs, *w1ts, b1, w2t, b2)
    return out[:M, :dout]


# ---------------------------------------------------------------------------
# Parameter init (deterministic, mimics torch.nn.Linear default uniform init;
# stored transposed and zero-padded to lane-aligned H / Dout)
# ---------------------------------------------------------------------------
def _linear_params_padded(key, in_features, out_features, out_pad):
    kw, kb = jax.random.split(key)
    bound = 1.0 / np.sqrt(in_features)
    w_t = jax.random.uniform(kw, (in_features, out_features), jnp.float32,
                             minval=-bound, maxval=bound)
    b = jax.random.uniform(kb, (out_features,), jnp.float32,
                           minval=-bound, maxval=bound)
    w_t = jnp.pad(w_t, ((0, 0), (0, out_pad - out_features)))
    b = jnp.pad(b, (0, out_pad - out_features)).reshape(1, out_pad)
    return w_t, b


def make_mlp_predictor_params(h_feats, num_classes=None, seed=0):
    key = jax.random.PRNGKey(seed)
    k1, k2 = jax.random.split(key)
    if num_classes is None:
        hidden, dout = h_feats, 1                      # W1: Linear(2h, h), W2: Linear(h, 1)
    else:
        hidden, dout = 10 * h_feats, num_classes       # W1: Linear(h, 10h), W2: Linear(10h, C)
    hp, dp = _round_up(hidden, 128), _round_up(dout, 128)

    in1 = 2 * h_feats if num_classes is None else h_feats
    w1t, b1 = _linear_params_padded(k1, in1, hidden, hp)          # (in1, Hp)
    w2t, b2 = _linear_params_padded(k2, hidden, dout, dp)         # (hidden, Dp)
    w2t = jnp.pad(w2t, ((0, hp - hidden), (0, 0)))                # zero rows -> (Hp, Dp)

    params = dict(num_classes=num_classes, h_feats=h_feats,
                  hidden=hidden, dout=dout, b1=b1, w2t=w2t, b2=b2)
    if num_classes is None:
        # split W1^T so the kernel can consume h[src], h[dst] without concat
        params["w1t_src"] = w1t[:h_feats]
        params["w1t_dst"] = w1t[h_feats:]
    else:
        params["w1t"] = w1t
    return params


# ---------------------------------------------------------------------------
# forward() equivalents
# ---------------------------------------------------------------------------
def mlp_predictor_forward_edges(params, h, src, dst, *, tile_m=512,
                                compute_dtype=jnp.bfloat16):
    """num_classes is None: score every edge. Returns (score[E], (src, dst))."""
    h_src = jnp.take(h, src, axis=0)                   # graph gather (XLA glue)
    h_dst = jnp.take(h, dst, axis=0)
    score = mlp_head([h_src, h_dst],
                     [params["w1t_src"], params["w1t_dst"]],
                     params["b1"], params["w2t"], params["b2"],
                     dout=params["dout"], tile_m=tile_m,
                     compute_dtype=compute_dtype)      # (E, 1)
    return score[:, 0], (src, dst)                     # torch .squeeze(1)


def mlp_predictor_forward_nodes(params, h, *, tile_m=512,
                                compute_dtype=jnp.bfloat16):
    """num_classes given: score every node. Returns (N, num_classes)."""
    score = mlp_head([h], [params["w1t"]],
                     params["b1"], params["w2t"], params["b2"],
                     dout=params["dout"], tile_m=tile_m,
                     compute_dtype=compute_dtype)      # (N, C)
    if score.shape[1] == 1:                            # torch .squeeze(1)
        score = score[:, 0]
    return score


# ---------------------------------------------------------------------------
if __name__ == "__main__":
    h_feats = 32
    n_nodes = 16
    n_edges = 64

    key = jax.random.PRNGKey(0)
    k_h, k_src, k_dst = jax.random.split(key, 3)
    h = jax.random.normal(k_h, (n_nodes, h_feats), jnp.float32)
    src = jax.random.randint(k_src, (n_edges,), 0, n_nodes, jnp.int32)
    dst = jax.random.randint(k_dst, (n_edges,), 0, n_nodes, jnp.int32)

    # ---- edge-scoring branch (num_classes=None) ----
    ep = make_mlp_predictor_params(h_feats, num_classes=None, seed=0)
    edge_scores, (e_src, e_dst) = mlp_predictor_forward_edges(ep, h, src, dst)
    edge_scores = jax.block_until_ready(edge_scores)
    assert edge_scores.shape == (n_edges,)

    # pure-f32 reference on the unpadded weight views (bf16 MXU -> loose tol)
    Hh = ep["hidden"]
    w1_full = jnp.concatenate([ep["w1t_src"], ep["w1t_dst"]], axis=0)[:, :Hh]
    ref_e = jax.nn.sigmoid(
        jnp.maximum(jnp.concatenate([h[src], h[dst]], axis=1) @ w1_full
                    + ep["b1"][:, :Hh], 0.0)
        @ ep["w2t"][:Hh, :1] + ep["b2"][:, :1])[:, 0]
    np.testing.assert_allclose(np.asarray(edge_scores), np.asarray(ref_e),
                               rtol=2e-2, atol=2e-2)

    # ---- node-classification branch (num_classes=4) ----
    npar = make_mlp_predictor_params(h_feats, num_classes=4, seed=1)
    node_scores = mlp_predictor_forward_nodes(npar, h)
    node_scores = jax.block_until_ready(node_scores)
    assert node_scores.shape == (n_nodes, 4)

    Hh = npar["hidden"]
    ref_n = jax.nn.sigmoid(
        jnp.maximum(h @ npar["w1t"][:, :Hh] + npar["b1"][:, :Hh], 0.0)
        @ npar["w2t"][:Hh, :4] + npar["b2"][:, :4])
    np.testing.assert_allclose(np.asarray(node_scores), np.asarray(ref_n),
                               rtol=2e-2, atol=2e-2)

    print("KERNEL_OK")
</pallas_src>

<mosaic_0001>
module attributes {stable_mosaic.version = 11 : i64} {
  func.func @kernel(%arg0: i32, %arg1: memref<64x32xf32, #tpu.memory_space<vmem>>, %arg2: memref<64x32xf32, #tpu.memory_space<vmem>>, %arg3: memref<32x128xbf16, #tpu.memory_space<vmem>>, %arg4: memref<32x128xbf16, #tpu.memory_space<vmem>>, %arg5: memref<1x128xf32, #tpu.memory_space<vmem>>, %arg6: memref<128x128xbf16, #tpu.memory_space<vmem>>, %arg7: memref<1x128xf32, #tpu.memory_space<vmem>>, %arg8: memref<64x128xf32, #tpu.memory_space<vmem>>) attributes {dimension_semantics = [#tpu.dimension_semantics<parallel>], iteration_bounds = array<i64: 1>, scalar_prefetch = 0 : i64, scratch_operands = 0 : i64, tpu.core_type = #tpu.core_type<tc>, window_params = [{transform_indices = @transform_0, window_bounds = array<i64: 64, 32>}, {transform_indices = @transform_1, window_bounds = array<i64: 64, 32>}, {pipeline_mode = #tpu.pipeline_mode<synchronous>, transform_indices = @transform_2, window_bounds = array<i64: 32, 128>}, {pipeline_mode = #tpu.pipeline_mode<synchronous>, transform_indices = @transform_3, window_bounds = array<i64: 32, 128>}, {pipeline_mode = #tpu.pipeline_mode<synchronous>, transform_indices = @transform_4, window_bounds = array<i64: 1, 128>}, {pipeline_mode = #tpu.pipeline_mode<synchronous>, transform_indices = @transform_5, window_bounds = array<i64: 128, 128>}, {pipeline_mode = #tpu.pipeline_mode<synchronous>, transform_indices = @transform_6, window_bounds = array<i64: 1, 128>}, {transform_indices = @transform_7, window_bounds = array<i64: 64, 128>}]} {
    %c0 = arith.constant 0 : index
    %c0_0 = arith.constant 0 : index
    %0 = vector.load %arg1[%c0, %c0_0] : memref<64x32xf32, #tpu.memory_space<vmem>>, vector<64x32xf32>
    %1 = arith.truncf %0 : vector<64x32xf32> to vector<64x32xbf16>
    %c0_1 = arith.constant 0 : index
    %c0_2 = arith.constant 0 : index
    %2 = vector.load %arg3[%c0_1, %c0_2] : memref<32x128xbf16, #tpu.memory_space<vmem>>, vector<32x128xbf16>
    %cst = arith.constant dense<0.000000e+00> : vector<64x128xf32>
    %3 = tpu.matmul %1, %2, %cst {dimension_numbers = #tpu.dot_dimension_numbers<[1], [0], [0], [1], [0, 0, 1, 1], [], []>} : vector<64x32xbf16>, vector<32x128xbf16>, vector<64x128xf32> -> vector<64x128xf32>
    %c0_3 = arith.constant 0 : index
    %c0_4 = arith.constant 0 : index
    %4 = vector.load %arg2[%c0_3, %c0_4] : memref<64x32xf32, #tpu.memory_space<vmem>>, vector<64x32xf32>
    %5 = arith.truncf %4 : vector<64x32xf32> to vector<64x32xbf16>
    %c0_5 = arith.constant 0 : index
    %c0_6 = arith.constant 0 : index
    %6 = vector.load %arg4[%c0_5, %c0_6] : memref<32x128xbf16, #tpu.memory_space<vmem>>, vector<32x128xbf16>
    %cst_7 = arith.constant dense<0.000000e+00> : vector<64x128xf32>
    %7 = tpu.matmul %5, %6, %cst_7 {dimension_numbers = #tpu.dot_dimension_numbers<[1], [0], [0], [1], [0, 0, 1, 1], [], []>} : vector<64x32xbf16>, vector<32x128xbf16>, vector<64x128xf32> -> vector<64x128xf32>
    %8 = arith.addf %3, %7 : vector<64x128xf32>
    %c0_8 = arith.constant 0 : index
    %c0_9 = arith.constant 0 : index
    %9 = vector.load %arg5[%c0_8, %c0_9] : memref<1x128xf32, #tpu.memory_space<vmem>>, vector<1x128xf32>
    %10 = vector.broadcast %9 : vector<1x128xf32> to vector<64x128xf32>
    %11 = arith.addf %8, %10 : vector<64x128xf32>
    %cst_10 = arith.constant 0.000000e+00 : f32
    %12 = vector.broadcast %cst_10 : f32 to vector<64x128xf32>
    %13 = arith.maximumf %11, %12 : vector<64x128xf32>
    %14 = arith.truncf %13 : vector<64x128xf32> to vector<64x128xbf16>
    %c0_11 = arith.constant 0 : index
    %c0_12 = arith.constant 0 : index
    %15 = vector.load %arg6[%c0_11, %c0_12] : memref<128x128xbf16, #tpu.memory_space<vmem>>, vector<128x128xbf16>
    %cst_13 = arith.constant dense<0.000000e+00> : vector<64x128xf32>
    %16 = tpu.matmul %14, %15, %cst_13 {dimension_numbers = #tpu.dot_dimension_numbers<[1], [0], [0], [1], [0, 0, 1, 1], [], []>} : vector<64x128xbf16>, vector<128x128xbf16>, vector<64x128xf32> -> vector<64x128xf32>
    %c0_14 = arith.constant 0 : index
    %c0_15 = arith.constant 0 : index
    %17 = vector.load %arg7[%c0_14, %c0_15] : memref<1x128xf32, #tpu.memory_space<vmem>>, vector<1x128xf32>
    %18 = vector.broadcast %17 : vector<1x128xf32> to vector<64x128xf32>
    %19 = arith.addf %16, %18 : vector<64x128xf32>
    %20 = arith.negf %19 : vector<64x128xf32>
    %21 = math.exp %20 : vector<64x128xf32>
    %cst_16 = arith.constant 1.000000e+00 : f32
    %22 = vector.broadcast %cst_16 : f32 to vector<64x128xf32>
    %23 = arith.addf %22, %21 : vector<64x128xf32>
    %24 = arith.divf %22, %23 : vector<64x128xf32>
    %c0_17 = arith.constant 0 : index
    %c0_18 = arith.constant 0 : index
    %25 = vector.load %arg8[%c0_17, %c0_18] : memref<64x128xf32, #tpu.memory_space<vmem>>, vector<64x128xf32>
    tpu.vector_store %arg8[%c0_17, %c0_18], %24 {strides = array<i32>} : memref<64x128xf32, #tpu.memory_space<vmem>>, vector<64x128xf32>,
    return
  }
  func.func @transform_0(%arg0: i32) -> (i32, i32) {
    %c0_i32 = arith.constant 0 : i32
    %c0_i32_0 = arith.constant 0 : i32
    return %arg0, %c0_i32 : i32, i32
  }
  func.func @transform_1(%arg0: i32) -> (i32, i32) {
    %c0_i32 = arith.constant 0 : i32
    %c0_i32_0 = arith.constant 0 : i32
    return %arg0, %c0_i32 : i32, i32
  }
  func.func @transform_2(%arg0: i32) -> (i32, i32) {
    %c0_i32 = arith.constant 0 : i32
    %c0_i32_0 = arith.constant 0 : i32
    %c0_i32_1 = arith.constant 0 : i32
    return %c0_i32, %c0_i32_0 : i32, i32
  }
  func.func @transform_3(%arg0: i32) -> (i32, i32) {
    %c0_i32 = arith.constant 0 : i32
    %c0_i32_0 = arith.constant 0 : i32
    %c0_i32_1 = arith.constant 0 : i32
    return %c0_i32, %c0_i32_0 : i32, i32
  }
  func.func @transform_4(%arg0: i32) -> (i32, i32) {
    %c0_i32 = arith.constant 0 : i32
    %c0_i32_0 = arith.constant 0 : i32
    %c0_i32_1 = arith.constant 0 : i32
    return %c0_i32, %c0_i32_0 : i32, i32
  }
  func.func @transform_5(%arg0: i32) -> (i32, i32) {
    %c0_i32 = arith.constant 0 : i32
    %c0_i32_0 = arith.constant 0 : i32
    %c0_i32_1 = arith.constant 0 : i32
    return %c0_i32, %c0_i32_0 : i32, i32
  }
  func.func @transform_6(%arg0: i32) -> (i32, i32) {
    %c0_i32 = arith.constant 0 : i32
    %c0_i32_0 = arith.constant 0 : i32
    %c0_i32_1 = arith.constant 0 : i32
    return %c0_i32, %c0_i32_0 : i32, i32
  }
  func.func @transform_7(%arg0: i32) -> (i32, i32) {
    %c0_i32 = arith.constant 0 : i32
    %c0_i32_0 = arith.constant 0 : i32
    return %arg0, %c0_i32 : i32, i32
  }
}

</mosaic_0001>

<bundles_post_ra>
// kernel: tpu_custom_call.1
= control target key start
LH: loop header
LB: loop body
LE: loop exit
PB: predicated region body
PF: predicated region fallthrough
CT: control target
= control target key end

     0   :  { %vm72_vm0 = vcmask 261120   ;;  %s808_s0 = inlined_call_operand.vmem [shape: f32[64,32], index: 0, kind: input, shape index: {}]   ;;  %s809_s1 = inlined_call_operand.vmem [shape: f32[64,32], index: 1, kind: input, shape index: {}]   ;;  %s810_s2 = inlined_call_operand.vmem [shape: bf16[32,128], index: 2, kind: input, shape index: {}]   ;;  %s811_s3 = inlined_call_operand.vmem [shape: bf16[32,128], index: 3, kind: input, shape index: {}]   ;;  %s812_s4 = inlined_call_operand.vmem [shape: f32[1,128], index: 4, kind: input, shape index: {}]   ;;  %s813_s5 = inlined_call_operand.vmem [shape: bf16[128,128], index: 5, kind: input, shape index: {}]   ;;  %s814_s6 = inlined_call_operand.vmem [shape: f32[1,128], index: 6, kind: input, shape index: {}]   ;;  %s815_s7 = inlined_call_operand.hbm [shape: f32[64,128], index: 7, kind: output, shape index: {}]  }
   0x1   :  { %v587_v0 = vld [vmem:[%s811_s3] sm:$0xff]   ;;  %v588_v1 = vld [vmem:[%s811_s3 + $0x8] sm:$0xff]   ;;  %v46_v4 = vld [vmem:[%s809_s1 + $0x10] sm:$0xff] }
   0x2   :  { %528 = vmatprep.subr.bf16.mxu0 %v587_v0  ;;  %v44_v2 = vld [vmem:[%s809_s1] sm:$0xff]  ;;  %v45_v3 = vld [vmem:[%s809_s1 + $0x8] sm:$0xff]  ;;  %v47_v6 = vld [vmem:[%s809_s1 + $0x18] sm:$0xff] }
   0x3   :  { %529 = vmatpush3.bf16.msra.mxu0 %v587_v0  ;;  %v52_v5 = vpack.c.bf16 %v45_v3, %v44_v2  ;;  %v589_v7 = vld [vmem:[%s810_s2] sm:$0xff]   ;;  %v49_v9 = vld [vmem:[%s809_s1 + $0x28] sm:$0xff]  ;;  %v53_v10 = vpack.c.bf16 %v47_v6, %v46_v4  ;;  %v50_v13 = vld [vmem:[%s809_s1 + $0x30] sm:$0xff] }
   0x4   :  { %530 = vmatprep.subr.bf16.mxu0 %v588_v1  ;;  %v48_v8 = vld [vmem:[%s809_s1 + $0x20] sm:$0xff]  ;;  %v590_v12 = vld [vmem:[%s810_s2 + $0x8] sm:$0xff]   ;;  %v51_v14 = vld [vmem:[%s809_s1 + $0x38] sm:$0xff] }
   0x5   :  { %532 = vmatprep.mubr.msk.bf16.mxu0 %vm72_vm0, %v52_v5  ;;  %v54_v11 = vpack.c.bf16 %v49_v9, %v48_v8  ;;  %v28_v15 = vld [vmem:[%s808_s0] sm:$0xff]  ;;  %v592_v17 = vld [vmem:[%s813_s5 + $0x8] sm:$0xff]   ;;  %v55_v19 = vpack.c.bf16 %v51_v14, %v50_v13  ;;  %v593_v20 = vld [vmem:[%s813_s5 + $0x10] sm:$0xff]  }
   0x6   :  { %v591_v16 = vld [vmem:[%s813_s5] sm:$0xff]   ;;  %v29_v18 = vld [vmem:[%s808_s0 + $0x8] sm:$0xff] }
   0x7   :  { %531 = vmatpush3.bf16.msra.mxu0 %v588_v1  ;;  %552 = vmatprep.subr.bf16.mxu1 %v591_v16  ;;  %v36_v21 = vpack.c.bf16 %v29_v18, %v28_v15 }
   0x8   :  { %540 = vmatprep.subr.bf16.mxu0 %v589_v7  ;;  %553 = vmatpush3.bf16.msra.mxu1 %v591_v16 }
   0x9   :  { %554 = vmatprep.subr.bf16.mxu1 %v592_v17 }
   0xa   :  { %533 = vmatmul.mubr.msk.bf16.vlgmr.msra.gmra.mrb[0].mxu0 %vm72_vm0, %v53_v10 }
   0xb   :  { %541 = vmatpush3.bf16.msra.mxu0 %v589_v7  ;;  %536 = vmatprep.mubr.msk.bf16.mxu0 %vm72_vm0, %v54_v11 }
   0xc   :  { %542 = vmatprep.subr.bf16.mxu0 %v590_v12 }
   0xf   :  { %543 = vmatpush3.bf16.msra.mxu0 %v590_v12 }
  0x10   :  { %12 = vsyncpa [#allocation3], 0  ;;  %555 = vmatpush3.bf16.msra.mxu1 %v592_v17  ;;  %v594_v22 = vld [vmem:[%s813_s5 + $0x18] sm:$0xff]   ;;  %v30_v23 = vld [vmem:[%s808_s0 + $0x10] sm:$0xff] }
  0x11   :  { %556 = vmatprep.subr.bf16.mxu1 %v593_v20  ;;  %v31_v24 = vld [vmem:[%s808_s0 + $0x18] sm:$0xff]  ;;  %v32_v25 = vld [vmem:[%s808_s0 + $0x20] sm:$0xff]  ;;  %v33_v26 = vld [vmem:[%s808_s0 + $0x28] sm:$0xff] }
  0x12   :  { %537 = vmatmul.mubr.msk.bf16.gmra.mrb[4].mxu0 %vm72_vm0, %v55_v19  ;;  %v37_v27 = vpack.c.bf16 %v31_v24, %v30_v23  ;;  %v595_v28 = vld [vmem:[%s813_s5 + $0x20] sm:$0xff]   ;;  %v38_v29 = vpack.c.bf16 %v33_v26, %v32_v25  ;;  %v596_v30 = vld [vmem:[%s813_s5 + $0x28] sm:$0xff]   ;;  %v34_v31 = vld [vmem:[%s808_s0 + $0x30] sm:$0xff] }
  0x13   :  { %544 = vmatprep.mubr.msk.bf16.mxu0 %vm72_vm0, %v36_v21  ;;  %v35_v32 = vld [vmem:[%s808_s0 + $0x38] sm:$0xff]  ;;  %v597_v34 = vld [vmem:[%s813_s5 + $0x30] sm:$0xff]   ;;  %v486_v36 = vld [vmem:[%s812_s4] ss:$0 sm:$0xff] }
  0x14   :  { %557 = vmatpush3.bf16.msra.mxu1 %v593_v20  ;;  %v39_v33 = vpack.c.bf16 %v35_v32, %v34_v31  ;;  %v598_v35 = vld [vmem:[%s813_s5 + $0x38] sm:$0xff]   ;;  %v487_v1 = vld [vmem:[%s814_s6] ss:$0 sm:$0xff]  ;;  %s655_s6 = smov [#allocation2]  }
  0x15   :  { %558 = vmatprep.subr.bf16.mxu1 %v594_v22  ;;  %s463_s1 = sshll.u32 %s655_s6, 4  ;;  %s464_s1 = int_to_ptr.vmem [resolvable:$true] %s463_s1 }
  0x16   :  { %s631_s30 = scalar_lea.vmem %s464_s1, 1024  ;;  %p636_p1 = scmp.lt.s32.totalorder %s464_s1, %s464_s1 }
  0x17   :  { %p632_p0 = scmp.ne.s32.totalorder %s464_s1, %s631_s30  ;;  %p637_p2 = scmp.lt.s32.totalorder %s631_s30, %s631_s30 }
  0x18   :  { %559 = vmatpush3.bf16.msra.mxu1 %v594_v22 }
  0x19   :  { %560 = vmatprep.subr.bf16.mxu1 %v595_v28  ;;  %p638_p3 = por %p637_p2, %p636_p1 }
  0x1a   :  { %545 = vmatmul.mubr.msk.bf16.vlgmr.msra.gmra.mrb[0].mxu0 %vm72_vm0, %v37_v27 }
  0x1b   :  { %548 = vmatprep.mubr.msk.bf16.mxu0 %vm72_vm0, %v38_v29  ;;  %p639_p4 = pnand %p638_p3, %p632_p0 }
  0x1c   :  { %561 = vmatpush3.bf16.msra.mxu1 %v595_v28 }
  0x1d   :  { %562 = vmatprep.subr.bf16.mxu1 %v596_v30 }
  0x20   :  { %563 = vmatpush3.bf16.msra.mxu1 %v596_v30 }
  0x21   :  { %564 = vmatprep.subr.bf16.mxu1 %v597_v34 }
  0x22   :  { %549 = vmatmul.mubr.msk.bf16.gmra.mrb[4].mxu0 %vm72_vm0, %v39_v33 }
  0x24   :  { %565 = vmatpush3.bf16.msra.mxu1 %v597_v34 }
  0x25   :  { %566 = vmatprep.subr.bf16.mxu1 %v598_v35 }
  0x28   :  { %567 = vmatpush3.bf16.msra.mxu1 %v598_v35 }
  0xed   :  { %v546_v37 = vpop.f32.mrb[0].mxu0 }
  0xee   :  { %v248_v38 = vadd.f32 %v546_v37, %v486_v36  ;;  %v208_v39 = vpop.f32.mrb[1].mxu0 }
  0xef   :  { %v246_v40 = vadd.f32 %v486_v36, %v208_v39  ;;  %v547_v41 = vpop.f32.mrb[2].mxu0 }
  0xf0   :  { %v249_v42 = vadd.f32 %v547_v41, %v486_v36  ;;  %v211_v43 = vpop.f32.mrb[3].mxu0  ;;  %v256_v45 = vmax.f32 %v248_v38, 0.0 }
  0xf1   :  { %v247_v44 = vadd.f32 %v486_v36, %v211_v43  ;;  %v254_v47 = vmax.f32 %v246_v40, 0.0 }
  0xf2   :  { %v257_v46 = vmax.f32 %v249_v42, 0.0 }
  0xf3   :  { %v255_v48 = vmax.f32 %v247_v44, 0.0 }
  0xf4   :  { %v263_v49 = vpack.c.bf16 %v257_v46, %v256_v45 }
  0xf5   :  { %v550_v50 = vpop.f32.mrb[4].mxu0  ;;  %v262_v51 = vpack.c.bf16 %v255_v48, %v254_v47 }
  0xf6   :  { %v252_v52 = vadd.f32 %v550_v50, %v486_v36  ;;  %v224_v53 = vpop.f32.mrb[5].mxu0 }
  0xf7   :  { %v250_v54 = vadd.f32 %v486_v36, %v224_v53  ;;  %v551_v55 = vpop.f32.mrb[6].mxu0  ;;  %568 = vmatprep.mubr.bf16.mxu1 %v262_v51 }
  0xf8   :  { %v253_v56 = vadd.f32 %v551_v55, %v486_v36  ;;  %v227_v57 = vpop.f32.mrb[7].mxu0  ;;  %569 = vmatmul.mubr.bf16.vlgmr.msra.gmra.mrb[0].mxu1 %v263_v49  ;;  %v260_v59 = vmax.f32 %v252_v52, 0.0 }
  0xf9   :  { %v251_v58 = vadd.f32 %v486_v36, %v227_v57  ;;  %v258_v61 = vmax.f32 %v250_v54, 0.0 }
  0xfa   :  { %v261_v60 = vmax.f32 %v253_v56, 0.0 }
  0xfb   :  { %v259_v62 = vmax.f32 %v251_v58, 0.0 }
  0xfc   :  { %v265_v63 = vpack.c.bf16 %v261_v60, %v260_v59 }
  0xfd   :  { %v264_v0 = vpack.c.bf16 %v259_v62, %v258_v61 }
  0xff   :  { %572 = vmatprep.mubr.bf16.mxu1 %v264_v0 }
 0x100   :  { %573 = vmatmul.mubr.bf16.gmra.mrb[4].mxu1 %v265_v63 }
 0x1cb   :  { %v570_v2 = vpop.f32.mrb[0].mxu1 }
 0x1cc   :  { %v380_v3 = vadd.f32 %v570_v2, %v487_v1  ;;  %v371_v4 = vpop.f32.mrb[1].mxu1 }
 0x1cd   :  { %v372_v5 = vadd.f32 %v487_v1, %v371_v4  ;;  %v571_v6 = vpop.f32.mrb[2].mxu1 }
 0x1ce   :  { %v498_v7 = vmul.f32 -1.442695, %v380_v3  ;;  %v383_v8 = vadd.f32 %v571_v6, %v487_v1  ;;  %v374_v9 = vpop.f32.mrb[3].mxu1 }
 0x1cf   :  { %v496_v10 = vmul.f32 -1.442695, %v372_v5  ;;  %v375_v11 = vadd.f32 %v487_v1, %v374_v9 }
 0x1d0   :  { %599 = vpow2.f32 %v498_v7  ;;  %v499_v12 = vmul.f32 -1.442695, %v383_v8 }
 0x1d1   :  { %601 = vpow2.f32 %v496_v10  ;;  %v497_v13 = vmul.f32 -1.442695, %v375_v11 }
 0x1d2   :  { %603 = vpow2.f32 %v499_v12 }
 0x1d3   :  { %605 = vpow2.f32 %v497_v13  ;;  %v574_v14 = vpop.f32.mrb[4].mxu1 }
 0x1d4   :  { %v396_v15 = vadd.f32 %v574_v14, %v487_v1  ;;  %v387_v16 = vpop.f32.mrb[5].mxu1 }
 0x1d5   :  { %v388_v17 = vadd.f32 %v487_v1, %v387_v16  ;;  %v575_v18 = vpop.f32.mrb[6].mxu1 }
 0x1d6   :  { %v502_v19 = vmul.f32 -1.442695, %v396_v15  ;;  %v399_v20 = vadd.f32 %v575_v18, %v487_v1  ;;  %v390_v21 = vpop.f32.mrb[7].mxu1 }
 0x1d7   :  { %v500_v22 = vmul.f32 -1.442695, %v388_v17  ;;  %v391_v23 = vadd.f32 %v487_v1, %v390_v21 }
 0x1d8   :  { %607 = vpow2.f32 %v502_v19  ;;  %v503_v24 = vmul.f32 -1.442695, %v399_v20 }
 0x1d9   :  { %609 = vpow2.f32 %v500_v22  ;;  %v501_v25 = vmul.f32 -1.442695, %v391_v23 }
 0x1da   :  { %v600_v26 = vpop.eup %599  ;;  %611 = vpow2.f32 %v503_v24 }
 0x1db   :  { %v602_v27 = vpop.eup %601  ;;  %v428_v28 = vadd.f32 1.0, %v600_v26  ;;  %613 = vpow2.f32 %v501_v25 }
 0x1dc   :  { %v604_v29 = vpop.eup %603  ;;  %v426_v30 = vadd.f32 1.0, %v602_v27 }
 0x1dd   :  { %v606_v31 = vpop.eup %605  ;;  %615 = vrcp.f32 %v428_v28  ;;  %v429_v32 = vadd.f32 1.0, %v604_v29 }
 0x1de   :  { %617 = vrcp.f32 %v426_v30  ;;  %v427_v33 = vadd.f32 1.0, %v606_v31 }
 0x1df   :  { %619 = vrcp.f32 %v429_v32 }
 0x1e0   :  { %621 = vrcp.f32 %v427_v33 }
 0x1e2   :  { %v608_v34 = vpop.eup %607 }
 0x1e3   :  { %v610_v35 = vpop.eup %609  ;;  %v432_v36 = vadd.f32 1.0, %v608_v34 }
 0x1e4   :  { %v612_v37 = vpop.eup %611  ;;  %v430_v38 = vadd.f32 1.0, %v610_v35 }
 0x1e5   :  { %v614_v39 = vpop.eup %613  ;;  %623 = vrcp.f32 %v432_v36  ;;  %v433_v40 = vadd.f32 1.0, %v612_v37 }
 0x1e6   :  { %625 = vrcp.f32 %v430_v38  ;;  %v431_v41 = vadd.f32 1.0, %v614_v39 }
 0x1e7   :  { %v616_v42 = vpop.eup %615  ;;  %627 = vrcp.f32 %v433_v40 }
 0x1e8   :  { %v618_v43 = vpop.eup %617  ;;  %452 = vst [vmem:[#allocation2 + $0x10] sm:$0xff] %v616_v42  ;;  %629 = vrcp.f32 %v431_v41 }
 0x1e9   :  { %v620_v44 = vpop.eup %619  ;;  %450 = vst [vmem:[#allocation2] sm:$0xff] %v618_v43 }
 0x1ea   :  { %v622_v45 = vpop.eup %621  ;;  %453 = vst [vmem:[#allocation2 + $0x18] sm:$0xff] %v620_v44 }
 0x1eb   :  { %451 = vst [vmem:[#allocation2 + $0x8] sm:$0xff] %v622_v45 }
 0x1ef   :  { %v624_v46 = vpop.eup %623 }
 0x1f0   :  { %v626_v47 = vpop.eup %625  ;;  %456 = vst [vmem:[#allocation2 + $0x30] sm:$0xff] %v624_v46 }
 0x1f1   :  { %v628_v48 = vpop.eup %627  ;;  %454 = vst [vmem:[#allocation2 + $0x20] sm:$0xff] %v626_v47 }
 0x1f2   :  { %v630_v49 = vpop.eup %629  ;;  %457 = vst [vmem:[#allocation2 + $0x38] sm:$0xff] %v628_v48 }
 0x1f3   :  { %455 = vst [vmem:[#allocation2 + $0x28] sm:$0xff] %v630_v49 }
 0x1f4   :  { %642 = shalt.err (!%p639_p4)
}
 0x1f5   :  { %s643_s10 = scalar_lea.hbm %s815_s7, 1024 }
 0x1f6   :  { %p644_p5 = scmp.ne.s32.totalorder %s815_s7, %s643_s10  ;;  %p647_p6 = scmp.lt.u32.totalorder %s643_s10, %s815_s7 }
 0x1f8   :  { %p649_p7 = pnand %p647_p6, %p644_p5 }
 0x1fa   :  { %652 = shalt.err (!%p649_p7)
}
 0x1fb   :  { %s656_s14 = smov 128   ;;  %s657_s15 = smov 8  }
 0x1fc   :  { %469 = dma.vmem_to_hbm [thread:$0]  %s464_s1, 1024, %s815_s7, [#allocation3], %s656_s14, %s656_s14, %s657_s15  }
 0x1fd   :  { %653 = dma.done.wait [#allocation3], 1024  }
 0x1fe   :  { %654 = vsyncadd [#allocation3], 4294966272 }
 0x1ff   :  { %473 = vsyncpa [#allocation3], 1 }

</bundles_post_ra>
